<compile_context>
chip_gen: v7x
topology: tpu7x:2x2x1
jax: 0.10.0
libtpu: 0.0.40
codegen_flags: <defaults>
</compile_context>

<pallas_src>
import functools

import jax
import jax.numpy as jnp
import numpy as np
from jax.experimental import pallas as pl
from jax.experimental.pallas import tpu as pltpu


def basic_block_kernel(x_ref, w1_ref, w2_ref, b_ref, o_ref,
                       xcat_ref, ycat_ref, *, H):
    """Whole batch in one step, everything lane-dense.

    x_ref    : (M, W*Cin)            M = N*H row-flattened input rows
    w1_ref   : (3*W*Cin, 2*W*Cout)   conv1 K-stacked row-matrices (BN1 scale
                                     folded); cols [W*Cout:] hold the fused 1x1
                                     shortcut (BN_sc scale folded, dh==1 only)
    w2_ref   : (3*W*Cout, W*Cout)    conv2 K-stacked row-matrices (BN2 scale folded)
    b_ref    : (2, W*Cout)           row 0: BN1 bias; row 1: BN2 bias + BN_sc bias
    o_ref    : (M, W*Cout)
    xcat_ref : (M, 3*W*Cin)   VMEM scratch, K-concat of shifted inputs
    ycat_ref : (M, 3*W*Cout)  VMEM scratch, K-concat of shifted conv1 outputs
    """
    M, WCout = o_ref.shape
    WCin = x_ref.shape[1]
    x = x_ref[...].astype(jnp.float32)

    # Per-image vertical edge masks — built once, shared by both convs.
    rows = jax.lax.broadcasted_iota(jnp.int32, (M, 1), 0)
    keep_top = (rows % H != 0).astype(jnp.float32)        # first row of each image
    keep_bot = (rows % H != H - 1).astype(jnp.float32)    # last row of each image

    def shift_up(a):     # result[r] = a[r-1]  (dh = 0 tap), zero at image top
        return pltpu.roll(a, shift=1, axis=0) * keep_top

    def shift_down(a):   # result[r] = a[r+1]  (dh = 2 tap), zero at image bottom
        return pltpu.roll(a, shift=a.shape[0] - 1, axis=0) * keep_bot

    # ---- conv1 (3x3, pad 1) + fused 1x1 shortcut: ONE matmul --------------
    xcat_ref[:, 0:WCin] = shift_up(x)
    xcat_ref[:, WCin:2 * WCin] = x
    xcat_ref[:, 2 * WCin:3 * WCin] = shift_down(x)
    acc1 = jnp.dot(xcat_ref[...], w1_ref[...],
                   preferred_element_type=jnp.float32)     # (M, 2*WCout)

    y1 = jnp.maximum(acc1[:, :WCout] + b_ref[0:1, :], 0.0)  # BN1 bias + ReLU
    sc = acc1[:, WCout:]                                     # shortcut branch

    # ---- conv2 (3x3, pad 1): ONE matmul ------------------------------------
    ycat_ref[:, 0:WCout] = shift_up(y1)
    ycat_ref[:, WCout:2 * WCout] = y1
    ycat_ref[:, 2 * WCout:3 * WCout] = shift_down(y1)
    acc2 = jnp.dot(ycat_ref[...], w2_ref[...],
                   preferred_element_type=jnp.float32)      # (M, WCout)

    # residual add (BN2 bias + shortcut-BN bias pre-summed) + final ReLU
    o_ref[...] = jnp.maximum(acc2 + sc + b_ref[1:2, :], 0.0).astype(o_ref.dtype)


def _row_conv_matrices_kstacked(w_hwio, width):
    """(3,3,Cin,Cout) conv kernel -> (3*width*Cin, width*Cout) K-stacked (dh-major)
    block-banded matrices mapping one input row to one output row. Zero padding
    along W is realized by dropping out-of-range taps."""
    mats = []
    for dh in range(3):
        m = 0.0
        for dw in range(3):
            # S[src, w] == 1  iff  src == w + dw - 1
            shift = jnp.eye(width, k=1 - dw, dtype=w_hwio.dtype)
            m = m + jnp.kron(shift, w_hwio[dh, dw])
        mats.append(m)
    return jnp.concatenate(mats, axis=0)


def prepare_block_params(params, W):
    """One-time repacking of BasicBlock params into the kernel's packed form.
    Call this at parameter-setup time (NOT per forward)."""
    Cin, Cout = params["w1"].shape[2], params["w1"].shape[3]
    WCin, WCout = W * Cin, W * Cout

    def lane(v):  # per-channel (C,)/(1,C) -> (W*C,) lane-dense (lane = w*C + c)
        return jnp.tile(jnp.reshape(v, (-1,)), W)

    s1, b1 = lane(params["s1"]), lane(params["b1"])
    s2, b2 = lane(params["s2"]), lane(params["b2"])
    ssc, bsc = lane(params["ssc"]), lane(params["bsc"])

    # conv1 residual columns with BN1 scale folded in.
    w1_res = _row_conv_matrices_kstacked(params["w1"], W) * s1[None, :]
    # 1x1 projection shortcut as extra columns (attached to the dh==1 K-block),
    # shortcut-BN scale folded in.
    wsc_band = jnp.kron(jnp.eye(W, dtype=params["wsc"].dtype), params["wsc"])
    w1_sc = jnp.concatenate([jnp.zeros_like(wsc_band), wsc_band,
                             jnp.zeros_like(wsc_band)], axis=0) * ssc[None, :]
    bigw1 = jnp.concatenate([w1_res, w1_sc], axis=1)          # (3*WCin, 2*WCout)

    bigw2 = _row_conv_matrices_kstacked(params["w2"], W) * s2[None, :]  # (3*WCout, WCout)

    bias_pack = jnp.stack([b1, b2 + bsc])                     # (2, WCout)
    return dict(w1=bigw1, w2=bigw2, bias=bias_pack)


def basic_block_pallas(x_nhwc, prepared):
    N, H, W, Cin = x_nhwc.shape
    WCin = W * Cin
    WCout = prepared["bias"].shape[1]
    Cout = WCout // W
    M = N * H

    x_rows = x_nhwc.reshape(M, WCin)        # batch folded into the M (sublane) axis

    out = pl.pallas_call(
        functools.partial(basic_block_kernel, H=H),
        out_shape=jax.ShapeDtypeStruct((M, WCout), x_nhwc.dtype),
        grid=(1,),                           # single step: no per-step overhead
        in_specs=[
            pl.BlockSpec((M, WCin), lambda i: (0, 0)),
            pl.BlockSpec((3 * WCin, 2 * WCout), lambda i: (0, 0)),
            pl.BlockSpec((3 * WCout, WCout), lambda i: (0, 0)),
            pl.BlockSpec((2, WCout), lambda i: (0, 0)),
        ],
        out_specs=pl.BlockSpec((M, WCout), lambda i: (0, 0)),
        scratch_shapes=[
            pltpu.VMEM((M, 3 * WCin), jnp.float32),
            pltpu.VMEM((M, 3 * WCout), jnp.float32),
        ],
    )(x_rows, prepared["w1"], prepared["w2"], prepared["bias"])

    return out.reshape(N, H, W, Cout)


def fold_bn(gamma, beta, mean, var, eps=1e-5):
    scale = gamma / jnp.sqrt(var + eps)
    bias = beta - mean * scale
    return scale.reshape(1, -1), bias.reshape(1, -1)


def make_params(key, cin, cout):
    ks = jax.random.split(key, 15)
    w1 = 0.1 * jax.random.normal(ks[0], (3, 3, cin, cout), jnp.float32)
    w2 = 0.1 * jax.random.normal(ks[1], (3, 3, cout, cout), jnp.float32)
    wsc = 0.1 * jax.random.normal(ks[2], (cin, cout), jnp.float32)

    def bn(k0, k1, k2, k3):
        gamma = jax.random.uniform(k0, (cout,), jnp.float32, 0.5, 1.5)
        beta = 0.1 * jax.random.normal(k1, (cout,), jnp.float32)
        mean = 0.1 * jax.random.normal(k2, (cout,), jnp.float32)
        var = jax.random.uniform(k3, (cout,), jnp.float32, 0.5, 1.5)
        return fold_bn(gamma, beta, mean, var)

    s1, b1 = bn(ks[3], ks[4], ks[5], ks[6])
    s2, b2 = bn(ks[7], ks[8], ks[9], ks[10])
    ssc, bsc = bn(ks[11], ks[12], ks[13], ks[14])
    return dict(w1=w1, s1=s1, b1=b1, w2=w2, s2=s2, b2=b2,
                wsc=wsc, ssc=ssc, bsc=bsc)


def reference_forward(x_nhwc, p):
    dn = ("NHWC", "HWIO", "NHWC")
    y = jax.lax.conv_general_dilated(x_nhwc, p["w1"], (1, 1),
                                     ((1, 1), (1, 1)), dimension_numbers=dn)
    y = jnp.maximum(y * p["s1"][0] + p["b1"][0], 0.0)
    y = jax.lax.conv_general_dilated(y, p["w2"], (1, 1),
                                     ((1, 1), (1, 1)), dimension_numbers=dn)
    y = y * p["s2"][0] + p["b2"][0]
    sc = jnp.einsum("nhwc,co->nhwo", x_nhwc, p["wsc"])
    sc = sc * p["ssc"][0] + p["bsc"][0]
    return jnp.maximum(y + sc, 0.0)


if __name__ == "__main__":
    # PyTorch-side shapes: x is NCHW (2, 4, 16, 16); BasicBlock(4, 8, stride=1)
    N, Cin, H, W = 2, 4, 16, 16
    Cout = 8

    key = jax.random.PRNGKey(0)
    kx, kp = jax.random.split(key)
    x_nchw = jax.random.normal(kx, (N, Cin, H, W), jnp.float32)
    x_nhwc = jnp.transpose(x_nchw, (0, 2, 3, 1))

    params = make_params(kp, Cin, Cout)
    prepared = prepare_block_params(params, W)      # one-time weight repacking
    prepared = jax.tree_util.tree_map(jax.block_until_ready, prepared)

    out = basic_block_pallas(x_nhwc, prepared)
    out = jax.block_until_ready(out)

    ref = jax.block_until_ready(reference_forward(x_nhwc, params))
    np.testing.assert_allclose(np.asarray(out), np.asarray(ref),
                               rtol=1e-3, atol=1e-3)

    print("KERNEL_OK")
</pallas_src>

<mosaic_0001>
module attributes {stable_mosaic.version = 11 : i64} {
  func.func @basic_block_kernel(%arg0: i32, %arg1: memref<32x64xf32, #tpu.memory_space<vmem>>, %arg2: memref<192x256xf32, #tpu.memory_space<vmem>>, %arg3: memref<384x128xf32, #tpu.memory_space<vmem>>, %arg4: memref<2x128xf32, #tpu.memory_space<vmem>>, %arg5: memref<32x128xf32, #tpu.memory_space<vmem>>, %arg6: memref<32x192xf32, #tpu.memory_space<vmem>>, %arg7: memref<32x384xf32, #tpu.memory_space<vmem>>) attributes {dimension_semantics = [#tpu.dimension_semantics<arbitrary>], iteration_bounds = array<i64: 1>, scalar_prefetch = 0 : i64, scratch_operands = 2 : i64, tpu.core_type = #tpu.core_type<tc>, window_params = [{pipeline_mode = #tpu.pipeline_mode<synchronous>, transform_indices = @transform_0, window_bounds = array<i64: 32, 64>}, {pipeline_mode = #tpu.pipeline_mode<synchronous>, transform_indices = @transform_1, window_bounds = array<i64: 192, 256>}, {pipeline_mode = #tpu.pipeline_mode<synchronous>, transform_indices = @transform_2, window_bounds = array<i64: 384, 128>}, {pipeline_mode = #tpu.pipeline_mode<synchronous>, transform_indices = @transform_3, window_bounds = array<i64: 2, 128>}, {pipeline_mode = #tpu.pipeline_mode<synchronous>, transform_indices = @transform_4, window_bounds = array<i64: 32, 128>}]} {
    %c0 = arith.constant 0 : index
    %c0_0 = arith.constant 0 : index
    %0 = vector.load %arg1[%c0, %c0_0] : memref<32x64xf32, #tpu.memory_space<vmem>>, vector<32x64xf32>
    %1 = tpu.iota {dimensions = array<i32: 0>} : vector<32x1xi32>
    %c16_i32 = arith.constant 16 : i32
    %c0_i32 = arith.constant 0 : i32
    %2 = arith.cmpi eq, %c16_i32, %c0_i32 : i32
    %c1_i32 = arith.constant 1 : i32
    %3 = arith.select %2, %c1_i32, %c16_i32 : i32
    %4 = vector.broadcast %3 : i32 to vector<32x1xi32>
    %5 = arith.remsi %1, %4 : vector<32x1xi32>
    %c0_i32_1 = arith.constant 0 : i32
    %6 = vector.broadcast %c0_i32_1 : i32 to vector<32x1xi32>
    %7 = arith.cmpi ne, %5, %6 : vector<32x1xi32>
    %c0_i32_2 = arith.constant 0 : i32
    %8 = vector.broadcast %c0_i32_2 : i32 to vector<32x1xi32>
    %9 = arith.cmpi slt, %5, %8 : vector<32x1xi32>
    %c0_i32_3 = arith.constant 0 : i32
    %10 = arith.cmpi slt, %3, %c0_i32_3 : i32
    %11 = vector.broadcast %10 : i1 to vector<32x1xi1>
    %12 = vector.broadcast %11 : vector<32x1xi1> to vector<32x1xi1>
    %13 = arith.xori %9, %12 : vector<32x1xi1>
    %14 = arith.andi %13, %7 : vector<32x1xi1>
    %15 = vector.broadcast %3 : i32 to vector<32x1xi32>
    %16 = arith.addi %5, %15 : vector<32x1xi32>
    %17 = arith.select %14, %16, %5 : vector<32x1xi1>, vector<32x1xi32>
    %c0_i32_4 = arith.constant 0 : i32
    %18 = vector.broadcast %c0_i32_4 : i32 to vector<32x1xi32>
    %19 = arith.cmpi ne, %17, %18 : vector<32x1xi32>
    %20 = arith.extui %19 : vector<32x1xi1> to vector<32x1xi32>
    %21 = arith.sitofp %20 : vector<32x1xi32> to vector<32x1xf32>
    %c16_i32_5 = arith.constant 16 : i32
    %c0_i32_6 = arith.constant 0 : i32
    %22 = arith.cmpi eq, %c16_i32_5, %c0_i32_6 : i32
    %c1_i32_7 = arith.constant 1 : i32
    %23 = arith.select %22, %c1_i32_7, %c16_i32_5 : i32
    %24 = vector.broadcast %23 : i32 to vector<32x1xi32>
    %25 = arith.remsi %1, %24 : vector<32x1xi32>
    %c0_i32_8 = arith.constant 0 : i32
    %26 = vector.broadcast %c0_i32_8 : i32 to vector<32x1xi32>
    %27 = arith.cmpi ne, %25, %26 : vector<32x1xi32>
    %c0_i32_9 = arith.constant 0 : i32
    %28 = vector.broadcast %c0_i32_9 : i32 to vector<32x1xi32>
    %29 = arith.cmpi slt, %25, %28 : vector<32x1xi32>
    %c0_i32_10 = arith.constant 0 : i32
    %30 = arith.cmpi slt, %23, %c0_i32_10 : i32
    %31 = vector.broadcast %30 : i1 to vector<32x1xi1>
    %32 = vector.broadcast %31 : vector<32x1xi1> to vector<32x1xi1>
    %33 = arith.xori %29, %32 : vector<32x1xi1>
    %34 = arith.andi %33, %27 : vector<32x1xi1>
    %35 = vector.broadcast %23 : i32 to vector<32x1xi32>
    %36 = arith.addi %25, %35 : vector<32x1xi32>
    %37 = arith.select %34, %36, %25 : vector<32x1xi1>, vector<32x1xi32>
    %c15_i32 = arith.constant 15 : i32
    %38 = vector.broadcast %c15_i32 : i32 to vector<32x1xi32>
    %39 = arith.cmpi ne, %37, %38 : vector<32x1xi32>
    %40 = arith.extui %39 : vector<32x1xi1> to vector<32x1xi32>
    %41 = arith.sitofp %40 : vector<32x1xi32> to vector<32x1xf32>
    %c1_i32_11 = arith.constant 1 : i32
    %42 = tpu.dynamic_rotate %0 by %c1_i32_11 dim 0 : vector<32x64xf32>, i32 -> vector<32x64xf32>
    %43 = vector.broadcast %21 : vector<32x1xf32> to vector<32x64xf32>
    %44 = arith.mulf %42, %43 : vector<32x64xf32>
    %c0_12 = arith.constant 0 : index
    %c0_13 = arith.constant 0 : index
    %45 = vector.load %arg6[%c0_12, %c0_13] : memref<32x192xf32, #tpu.memory_space<vmem>>, vector<32x64xf32>
    tpu.vector_store %arg6[%c0_12, %c0_13], %44 {strides = array<i32>} : memref<32x192xf32, #tpu.memory_space<vmem>>, vector<32x64xf32>,
    %c0_14 = arith.constant 0 : index
    %c64 = arith.constant 64 : index
    %46 = vector.load %arg6[%c0_14, %c64] : memref<32x192xf32, #tpu.memory_space<vmem>>, vector<32x64xf32>
    tpu.vector_store %arg6[%c0_14, %c64], %0 {strides = array<i32>} : memref<32x192xf32, #tpu.memory_space<vmem>>, vector<32x64xf32>,
    %c31_i32 = arith.constant 31 : i32
    %47 = tpu.dynamic_rotate %0 by %c31_i32 dim 0 : vector<32x64xf32>, i32 -> vector<32x64xf32>
    %48 = vector.broadcast %41 : vector<32x1xf32> to vector<32x64xf32>
    %49 = arith.mulf %47, %48 : vector<32x64xf32>
    %c0_15 = arith.constant 0 : index
    %c128 = arith.constant 128 : index
    %50 = vector.load %arg6[%c0_15, %c128] : memref<32x192xf32, #tpu.memory_space<vmem>>, vector<32x64xf32>
    tpu.vector_store %arg6[%c0_15, %c128], %49 {strides = array<i32>} : memref<32x192xf32, #tpu.memory_space<vmem>>, vector<32x64xf32>,
    %c0_16 = arith.constant 0 : index
    %c0_17 = arith.constant 0 : index
    %51 = vector.load %arg6[%c0_16, %c0_17] : memref<32x192xf32, #tpu.memory_space<vmem>>, vector<32x192xf32>
    %c0_18 = arith.constant 0 : index
    %c0_19 = arith.constant 0 : index
    %52 = vector.load %arg2[%c0_18, %c0_19] : memref<192x256xf32, #tpu.memory_space<vmem>>, vector<192x256xf32>
    %cst = arith.constant dense<0.000000e+00> : vector<32x256xf32>
    %53 = tpu.matmul %51, %52, %cst {dimension_numbers = #tpu.dot_dimension_numbers<[1], [0], [0], [1], [0, 0, 1, 1], [], []>} : vector<32x192xf32>, vector<192x256xf32>, vector<32x256xf32> -> vector<32x256xf32>
    %54 = vector.extract_strided_slice %53 {offsets = [0, 0], sizes = [32, 128], strides = [1, 1]} : vector<32x256xf32> to vector<32x128xf32>
    %c0_20 = arith.constant 0 : index
    %c0_21 = arith.constant 0 : index
    %55 = vector.load %arg4[%c0_20, %c0_21] : memref<2x128xf32, #tpu.memory_space<vmem>>, vector<1x128xf32>
    %56 = vector.broadcast %55 : vector<1x128xf32> to vector<32x128xf32>
    %57 = arith.addf %54, %56 : vector<32x128xf32>
    %cst_22 = arith.constant 0.000000e+00 : f32
    %58 = vector.broadcast %cst_22 : f32 to vector<32x128xf32>
    %59 = arith.maximumf %57, %58 : vector<32x128xf32>
    %60 = vector.extract_strided_slice %53 {offsets = [0, 128], sizes = [32, 128], strides = [1, 1]} : vector<32x256xf32> to vector<32x128xf32>
    %c1_i32_23 = arith.constant 1 : i32
    %61 = tpu.dynamic_rotate %59 by %c1_i32_23 dim 0 : vector<32x128xf32>, i32 -> vector<32x128xf32>
    %62 = vector.broadcast %21 : vector<32x1xf32> to vector<32x128xf32>
    %63 = arith.mulf %61, %62 : vector<32x128xf32>
    %c0_24 = arith.constant 0 : index
    %c0_25 = arith.constant 0 : index
    %64 = vector.load %arg7[%c0_24, %c0_25] : memref<32x384xf32, #tpu.memory_space<vmem>>, vector<32x128xf32>
    tpu.vector_store %arg7[%c0_24, %c0_25], %63 {strides = array<i32>} : memref<32x384xf32, #tpu.memory_space<vmem>>, vector<32x128xf32>,
    %c0_26 = arith.constant 0 : index
    %c128_27 = arith.constant 128 : index
    %65 = vector.load %arg7[%c0_26, %c128_27] : memref<32x384xf32, #tpu.memory_space<vmem>>, vector<32x128xf32>
    tpu.vector_store %arg7[%c0_26, %c128_27], %59 {strides = array<i32>} : memref<32x384xf32, #tpu.memory_space<vmem>>, vector<32x128xf32>,
    %c31_i32_28 = arith.constant 31 : i32
    %66 = tpu.dynamic_rotate %59 by %c31_i32_28 dim 0 : vector<32x128xf32>, i32 -> vector<32x128xf32>
    %67 = vector.broadcast %41 : vector<32x1xf32> to vector<32x128xf32>
    %68 = arith.mulf %66, %67 : vector<32x128xf32>
    %c0_29 = arith.constant 0 : index
    %c256 = arith.constant 256 : index
    %69 = vector.load %arg7[%c0_29, %c256] : memref<32x384xf32, #tpu.memory_space<vmem>>, vector<32x128xf32>
    tpu.vector_store %arg7[%c0_29, %c256], %68 {strides = array<i32>} : memref<32x384xf32, #tpu.memory_space<vmem>>, vector<32x128xf32>,
    %c0_30 = arith.constant 0 : index
    %c0_31 = arith.constant 0 : index
    %70 = vector.load %arg7[%c0_30, %c0_31] : memref<32x384xf32, #tpu.memory_space<vmem>>, vector<32x384xf32>
    %c0_32 = arith.constant 0 : index
    %c0_33 = arith.constant 0 : index
    %71 = vector.load %arg3[%c0_32, %c0_33] : memref<384x128xf32, #tpu.memory_space<vmem>>, vector<384x128xf32>
    %cst_34 = arith.constant dense<0.000000e+00> : vector<32x128xf32>
    %72 = tpu.matmul %70, %71, %cst_34 {dimension_numbers = #tpu.dot_dimension_numbers<[1], [0], [0], [1], [0, 0, 1, 1], [], []>} : vector<32x384xf32>, vector<384x128xf32>, vector<32x128xf32> -> vector<32x128xf32>
    %73 = arith.addf %72, %60 : vector<32x128xf32>
    %c1 = arith.constant 1 : index
    %c0_35 = arith.constant 0 : index
    %74 = vector.load %arg4[%c1, %c0_35] : memref<2x128xf32, #tpu.memory_space<vmem>>, vector<1x128xf32>
    %75 = vector.broadcast %74 : vector<1x128xf32> to vector<32x128xf32>
    %76 = arith.addf %73, %75 : vector<32x128xf32>
    %cst_36 = arith.constant 0.000000e+00 : f32
    %77 = vector.broadcast %cst_36 : f32 to vector<32x128xf32>
    %78 = arith.maximumf %76, %77 : vector<32x128xf32>
    %c0_37 = arith.constant 0 : index
    %c0_38 = arith.constant 0 : index
    %79 = vector.load %arg5[%c0_37, %c0_38] : memref<32x128xf32, #tpu.memory_space<vmem>>, vector<32x128xf32>
    tpu.vector_store %arg5[%c0_37, %c0_38], %78 {strides = array<i32>} : memref<32x128xf32, #tpu.memory_space<vmem>>, vector<32x128xf32>,
    return
  }
  func.func @transform_0(%arg0: i32) -> (i32, i32) {
    %c0_i32 = arith.constant 0 : i32
    %c0_i32_0 = arith.constant 0 : i32
    %c0_i32_1 = arith.constant 0 : i32
    return %c0_i32, %c0_i32_0 : i32, i32
  }
  func.func @transform_1(%arg0: i32) -> (i32, i32) {
    %c0_i32 = arith.constant 0 : i32
    %c0_i32_0 = arith.constant 0 : i32
    %c0_i32_1 = arith.constant 0 : i32
    return %c0_i32, %c0_i32_0 : i32, i32
  }
  func.func @transform_2(%arg0: i32) -> (i32, i32) {
    %c0_i32 = arith.constant 0 : i32
    %c0_i32_0 = arith.constant 0 : i32
    %c0_i32_1 = arith.constant 0 : i32
    return %c0_i32, %c0_i32_0 : i32, i32
  }
  func.func @transform_3(%arg0: i32) -> (i32, i32) {
    %c0_i32 = arith.constant 0 : i32
    %c0_i32_0 = arith.constant 0 : i32
    %c0_i32_1 = arith.constant 0 : i32
    return %c0_i32, %c0_i32_0 : i32, i32
  }
  func.func @transform_4(%arg0: i32) -> (i32, i32) {
    %c0_i32 = arith.constant 0 : i32
    %c0_i32_0 = arith.constant 0 : i32
    %c0_i32_1 = arith.constant 0 : i32
    return %c0_i32, %c0_i32_0 : i32, i32
  }
}

</mosaic_0001>

<bundles_post_ra>
// kernel: tpu_custom_call.1
= control target key start
LH: loop header
LB: loop body
LE: loop exit
PB: predicated region body
PF: predicated region fallthrough
CT: control target
= control target key end

     0   :  { %9 = vsyncpa [#allocation5], 0  ;;  %s1183_s0 = inlined_call_operand.hbm [shape: f32[32,64], index: 0, kind: input, shape index: {}]   ;;  %s1184_s1 = inlined_call_operand.hbm [shape: f32[192,256], index: 1, kind: input, shape index: {}]   ;;  %s1185_s2 = inlined_call_operand.hbm [shape: f32[384,128], index: 2, kind: input, shape index: {}]   ;;  %s1186_s3 = inlined_call_operand.vmem [shape: f32[2,128], index: 3, kind: input, shape index: {}]   ;;  %s1187_s4 = inlined_call_operand.hbm [shape: f32[32,128], index: 4, kind: output, shape index: {}]  }
   0x1   :  { %10 = vsyncpa [#allocation8], 0 }
   0x2   :  { %11 = vsyncpa [#allocation6], 0  ;;  %s995_s15 = smov [#allocation7]   ;;  %s901_s19 = scalar_lea.hbm %s1184_s1, 6144 }
   0x3   :  { %s29_s16 = sshll.u32 %s995_s15, 4  ;;  %p902_p0 = scmp.ne.s32.totalorder %s1184_s1, %s901_s19  ;;  %s30_s16 = int_to_ptr.vmem [resolvable:$true] %s29_s16 }
   0x4   :  { %p905_p1 = scmp.lt.u32.totalorder %s901_s19, %s1184_s1 }
   0x6   :  { %p907_p2 = pnand %p905_p1, %p902_p0 }
   0x8   :  { %910 = shalt.err (!%p907_p2)
}
   0x9   :  { %s911_s24 = scalar_lea.vmem %s30_s16, 6144  ;;  %p916_p4 = scmp.lt.s32.totalorder %s30_s16, %s30_s16 }
   0xa   :  { %p912_p3 = scmp.ne.s32.totalorder %s30_s16, %s911_s24  ;;  %p917_p5 = scmp.lt.s32.totalorder %s911_s24, %s911_s24 }
   0xc   :  { %p918_p6 = por %p917_p5, %p916_p4 }
   0xe   :  { %p919_p7 = pnand %p918_p6, %p912_p3 }
  0x10   :  { %922 = shalt.err (!%p919_p7)
}
  0x11   :  { %s996_s25 = smov 256   ;;  %s997_s26 = smov 16  }
  0x12   :  { %35 = dma.hbm_to_vmem [thread:$0]  %s1184_s1, 6144, %s30_s16, [#allocation8], %s996_s25, %s996_s25, %s997_s26  }
  0x13   :  { %s998_s29 = smov [#allocation4]   ;;  %s923_s7 = scalar_lea.hbm %s1183_s0, 512 }
  0x14   :  { %s17_s30 = sshll.u32 %s998_s29, 4  ;;  %p924_p8 = scmp.ne.s32.totalorder %s1183_s0, %s923_s7  ;;  %s18_s30 = int_to_ptr.vmem [resolvable:$true] %s17_s30 }
  0x15   :  { %p927_p9 = scmp.lt.u32.totalorder %s923_s7, %s1183_s0 }
  0x17   :  { %p929_p10 = pnand %p927_p9, %p924_p8 }
  0x19   :  { %932 = shalt.err (!%p929_p10)
}
  0x1a   :  { %s933_s12 = scalar_lea.vmem %s18_s30, 512  ;;  %p938_p12 = scmp.lt.s32.totalorder %s18_s30, %s18_s30 }
  0x1b   :  { %p934_p11 = scmp.ne.s32.totalorder %s18_s30, %s933_s12  ;;  %p939_p13 = scmp.lt.s32.totalorder %s933_s12, %s933_s12 }
  0x1d   :  { %p940_p0 = por %p939_p13, %p938_p12 }
  0x1f   :  { %p941_p1 = pnand %p940_p0, %p934_p11 }
  0x21   :  { %944 = shalt.err (!%p941_p1)
}
  0x22   :  { %s999_s1 = smov 128   ;;  %s1000_s13 = smov 8  }
  0x23   :  { %23 = dma.hbm_to_vmem [thread:$0]  %s1183_s0, 512, %s18_s30, [#allocation5], %s999_s1, %s999_s1, %s1000_s13  }
  0x24   :  { %s1001_s16 = smov [#allocation9]   ;;  %s945_s20 = scalar_lea.hbm %s1185_s2, 6144 }
  0x25   :  { %s41_s17 = sshll.u32 %s1001_s16, 4  ;;  %p946_p2 = scmp.ne.s32.totalorder %s1185_s2, %s945_s20  ;;  %s42_s17 = int_to_ptr.vmem [resolvable:$true] %s41_s17 }
  0x26   :  { %p949_p3 = scmp.lt.u32.totalorder %s945_s20, %s1185_s2 }
  0x28   :  { %p951_p4 = pnand %p949_p3, %p946_p2 }
  0x2a   :  { %954 = shalt.err (!%p951_p4)
}
  0x2b   :  { %s955_s25 = scalar_lea.vmem %s42_s17, 6144  ;;  %p960_p6 = scmp.lt.s32.totalorder %s42_s17, %s42_s17 }
  0x2c   :  { %p956_p5 = scmp.ne.s32.totalorder %s42_s17, %s955_s25  ;;  %p961_p7 = scmp.lt.s32.totalorder %s955_s25, %s955_s25 }
  0x2e   :  { %p962_p8 = por %p961_p7, %p960_p6 }
  0x30   :  { %p963_p9 = pnand %p962_p8, %p956_p5 }
  0x32   :  { %966 = shalt.err (!%p963_p9)
}
  0x33   :  { %47 = dma.hbm_to_vmem [thread:$0]  %s1185_s2, 6144, %s42_s17, [#allocation8], %s999_s1, %s999_s1, %s1000_s13  }
  0x34   :  { %989 = dma.done.wait [#allocation5], 512  }
  0x35   :  { %990 = vsyncadd [#allocation5], 4294966784 }
  0x36   :  { %991 = dma.done.wait [#allocation8], 12288  }
  0x37   :  { %992 = vsyncadd [#allocation8], 4294955008  ;;  %v63_v0 = vlaneseq  ;;  %vm153_vm0 = vcmask 523264   ;;  %v59_v8 = vld [vmem:[#allocation4] sm:$0xff]  ;;  %v60_v9 = vld [vmem:[#allocation4 + $0x8] sm:$0xff]  ;;  %s1002_s2 = smov 64  }
  0x38   :  { %v61_v10 = vld [vmem:[#allocation4 + $0x10] sm:$0xff]  ;;  %162 = vrot.lane.b32.xlu0 %v59_v8, %s1002_s2  ;;  %v140_v13 = vrot.slane %v59_v8, 7  ;;  %v179_v14 = vrot.slane %v59_v8, 1  ;;  %v141_v15 = vrot.slane %v60_v9, 7  ;;  %v180_v16 = vrot.slane %v60_v9, 1  ;;  %v62_v17 = vld [vmem:[#allocation4 + $0x18] sm:$0xff] }
  0x39   :  { %v1072_v1 = vshrl.u32 %v63_v0, 7  ;;  %166 = vrot.lane.b32.xlu1 %v61_v10, %s1002_s2  ;;  %v205_v18 = vld [vmem:[#allocation7 + $0x8] sm:$0xff]  ;;  %v142_v19 = vrot.slane %v61_v10, 7  ;;  %v181_v20 = vrot.slane %v61_v10, 1  ;;  %v207_v21 = vld [vmem:[#allocation7 + $0x18] sm:$0xff]  ;;  %v204_v22 = vld [vmem:[#allocation7] sm:$0xff] }
  0x3a   :  { %v1003_v25 = vmov 0.0   ;;  %v206_v28 = vld [vmem:[#allocation7 + $0x10] sm:$0xff]  ;;  %v209_v29 = vld [vmem:[#allocation7 + $0x28] sm:$0xff]  ;;  %v211_v30 = vld [vmem:[#allocation7 + $0x38] sm:$0xff]  ;;  %v143_v37 = vrot.slane %v62_v17, 7  ;;  %v182_v38 = vrot.slane %v62_v17, 1  ;;  %v779_v39 = vpack.c.bf16 %v207_v21, %v205_v18 }
  0x3b   :  { %v65_v2 = vadd.s32 8, %v1072_v1  ;;  %v66_v3 = vadd.s32 16, %v1072_v1  ;;  %v67_v4 = vadd.s32 24, %v1072_v1  ;;  %v72_v5 = vand.u32 15, %v1072_v1  ;;  %v208_v42 = vld [vmem:[#allocation7 + $0x20] sm:$0xff]  ;;  %v210_v43 = vld [vmem:[#allocation7 + $0x30] sm:$0xff] }
  0x3c   :  { %vm144_vm1 = vcmp.lt.s32.totalorder %v1072_v1, 1  ;;  %vm183_vm2 = vcmp.lt.s32.totalorder %v1072_v1, 7  ;;  %164 = vrot.lane.b32.xlu0 %v60_v9, %s1002_s2  ;;  %v781_v40 = vpack.c.bf16 %v206_v28, %v204_v22  ;;  %v783_v41 = vpack.c.bf16 %v211_v30, %v209_v29  ;;  %v213_v46 = vld [vmem:[#allocation7 + $0x48] sm:$0xff]  ;;  %v215_v47 = vld [vmem:[#allocation7 + $0x58] sm:$0xff]  ;;  %780 = vmatprep.subr.bf16.mxu0 %v779_v39  ;;  %v212_v54 = vld [vmem:[#allocation7 + $0x40] sm:$0xff]  ;;  %s1004_s5 = smov [#allocation10]  }
  0x3d   :  { %v79_v6 = vand.u32 15, %v65_v2  ;;  %v86_v7 = vand.u32 15, %v66_v3  ;;  %v93_v11 = vand.u32 15, %v67_v4  ;;  %vm1080_vm3 = vcmp.ne.s32.totalorder %v72_v5, 0  ;;  %168 = vrot.lane.b32.xlu1 %v62_v17, %s1002_s2  ;;  %v214_v55 = vld [vmem:[#allocation7 + $0x50] sm:$0xff]  ;;  %v217_v56 = vld [vmem:[#allocation7 + $0x68] sm:$0xff] }
  0x3e   :  { %v147_v23 = vsel %vm144_vm1, %v140_v13, %v141_v15  ;;  %v186_v24 = vsel %vm183_vm2, %v179_v14, %v180_v16  ;;  %v146_v31 = vsel %vm144_vm1, %v141_v15, %v142_v19  ;;  %v185_v32 = vsel %vm183_vm2, %v180_v16, %v181_v20  ;;  %782 = vmatpush1.bf16.msra.mxu0 %v781_v40  ;;  %v219_v57 = vld [vmem:[#allocation7 + $0x78] sm:$0xff]  ;;  %v216_v60 = vld [vmem:[#allocation7 + $0x60] sm:$0xff]  ;;  %v218_v61 = vld [vmem:[#allocation7 + $0x70] sm:$0xff]  ;;  %s654_s6 = sshll.u32 %s1004_s5, 4  ;;  %s655_s6 = int_to_ptr.vmem [resolvable:$true] %s654_s6 }
  0x3f   :  { %vm118_vm4 = vcmp.ne.s32.totalorder %v86_v7, 0  ;;  %vm129_vm5 = vcmp.ne.s32.totalorder %v79_v6, 15  ;;  %192 = vst.msk [vmem:[#allocation2 + $0x8] sm:$0xff] %vm153_vm0, %v186_v24  ;;  %155 = vst.msk [vmem:[#allocation2 + $0x10] sm:$0xff] %vm153_vm0, %v147_v23  ;;  %v1102_v33 = vsel %vm1080_vm3, 1.0, %v1003_v25  ;;  %vm131_vm6 = vcmp.ne.s32.totalorder %v93_v11, 15  ;;  %784 = vmatprep.subr.bf16.mxu0 %v783_v41  ;;  %p972_p11 = scmp.lt.s32.totalorder %s655_s6, %s655_s6 }
  0x40   :  { %v1090_v26 = vsel %vm118_vm4, 1.0, %v1003_v25  ;;  %v1092_v27 = vsel %vm129_vm5, 1.0, %v1003_v25  ;;  %v1107_v36 = vsel %vm131_vm6, 1.0, %v1003_v25  ;;  %v145_v44 = vsel %vm144_vm1, %v142_v19, %v143_v37  ;;  %v221_v62 = vld [vmem:[#allocation7 + $0x88] sm:$0xff]  ;;  %v223_v63 = vld [vmem:[#allocation7 + $0x98] sm:$0xff]  ;;  %v220_v2 = vld [vmem:[#allocation7 + $0x80] sm:$0xff] }
  0x41   :  { %v151_v34 = vmul.f32 %v1090_v26, %v146_v31  ;;  %v189_v35 = vmul.f32 %v1092_v27, %v185_v32  ;;  %v148_v45 = vsel %vm144_vm1, %v143_v37, %v140_v13  ;;  %v184_v49 = vsel %vm183_vm2, %v181_v20, %v182_v38  ;;  %157 = vst.msk [vmem:[#allocation2 + $0x30] sm:$0xff] %vm153_vm0, %v145_v44  ;;  %v222_v4 = vld [vmem:[#allocation7 + $0x90] sm:$0xff]  ;;  %v225_v5 = vld [vmem:[#allocation7 + $0xa8] sm:$0xff]  ;;  %v227_v7 = vld [vmem:[#allocation7 + $0xb8] sm:$0xff] }
  0x42   :  { %v149_v48 = vmul.f32 %v1102_v33, %v148_v45  ;;  %v187_v50 = vsel %vm183_vm2, %v182_v38, %v179_v14  ;;  %194 = vst.msk [vmem:[#allocation2 + $0x28] sm:$0xff] %vm153_vm0, %v184_v49  ;;  %v785_v52 = vpack.c.bf16 %v210_v43, %v208_v42  ;;  %v787_v53 = vpack.c.bf16 %v215_v47, %v213_v46  ;;  %v430_v8 = vld [vmem:[#allocation9 + $0x80] sm:$0xff]  ;;  %v431_v9 = vld [vmem:[#allocation9 + $0x88] sm:$0xff]  ;;  %v432_v14 = vld [vmem:[#allocation9 + $0x90] sm:$0xff] }
  0x43   :  { %193 = vst.msk [vmem:[#allocation2 + $0x18] sm:$0xff] %vm153_vm0, %v189_v35  ;;  %156 = vst.msk [vmem:[#allocation2 + $0x20] sm:$0xff] %vm153_vm0, %v151_v34  ;;  %v191_v51 = vmul.f32 %v1107_v36, %v187_v50  ;;  %v789_v58 = vpack.c.bf16 %v214_v55, %v212_v54  ;;  %v791_v59 = vpack.c.bf16 %v219_v57, %v217_v56  ;;  %v224_v10 = vld [vmem:[#allocation7 + $0xa0] sm:$0xff]  ;;  %v415_v13 = vld [vmem:[#allocation9 + $0x8] sm:$0xff]  ;;  %vm174_vm7 = vcmask 1048064  }
  0x44   :  { %154 = vst.msk [vmem:[#allocation2] sm:$0xff] %vm153_vm0, %v149_v48  ;;  %786 = vmatpush1.bf16.msra.mxu0 %v785_v52  ;;  %v793_v0 = vpack.c.bf16 %v218_v61, %v216_v60  ;;  %v795_v3 = vpack.c.bf16 %v223_v63, %v221_v62  ;;  %v827_v11 = vpack.c.bf16 %v431_v9, %v430_v8  ;;  %v414_v12 = vld [vmem:[#allocation9] sm:$0xff]  ;;  %v433_v17 = vld [vmem:[#allocation9 + $0x98] sm:$0xff]  ;;  %v416_v18 = vld [vmem:[#allocation9 + $0x10] sm:$0xff] }
  0x45   :  { %195 = vst.msk [vmem:[#allocation2 + $0x38] sm:$0xff] %vm153_vm0, %v191_v51  ;;  %788 = vmatprep.subr.bf16.mxu0 %v787_v53  ;;  %v797_v15 = vpack.c.bf16 %v222_v4, %v220_v2  ;;  %v829_v16 = vpack.c.bf16 %v415_v13, %v414_v12  ;;  %v417_v19 = vld [vmem:[#allocation9 + $0x18] sm:$0xff]  ;;  %v799_v20 = vpack.c.bf16 %v227_v7, %v225_v5  ;;  %v226_v21 = vld [vmem:[#allocation7 + $0xb0] sm:$0xff]  ;;  %v434_v23 = vld [vmem:[#allocation9 + $0xa0] sm:$0xff] }
  0x46   :  { %v197_v6 = vld [vmem:[#allocation2 + $0x8] sm:$0xff]  ;;  %828 = vmatprep.subr.bf16.mxu1 %v827_v11  ;;  %v831_v22 = vpack.c.bf16 %v433_v17, %v432_v14  ;;  %v231_v28 = vld [vmem:[#allocation7 + $0xd8] sm:$0xff]  ;;  %v833_v29 = vpack.c.bf16 %v417_v19, %v416_v18  ;;  %v418_v31 = vld [vmem:[#allocation9 + $0x20] sm:$0xff]  ;;  %v801_v34 = vpack.c.bf16 %v226_v21, %v224_v10 }
  0x47   :  { %671 = vmatprep.mubr.msk.f32.mxu0 %vm153_vm0, %v197_v6  ;;  %v435_v24 = vld [vmem:[#allocation9 + $0xa8] sm:$0xff]  ;;  %830 = vmatpush3.bf16.msra.mxu1 %v829_v16  ;;  %v228_v37 = vld [vmem:[#allocation7 + $0xc0] sm:$0xff]  ;;  %v230_v38 = vld [vmem:[#allocation7 + $0xd0] sm:$0xff] }
  0x48   :  { %790 = vmatpush1.bf16.msra.mxu0 %v789_v58  ;;  %v229_v25 = vld [vmem:[#allocation7 + $0xc8] sm:$0xff]  ;;  %832 = vmatprep.subr.bf16.mxu1 %v831_v22  ;;  %v835_v30 = vpack.c.bf16 %v435_v24, %v434_v23  ;;  %v235_v40 = vld [vmem:[#allocation7 + $0xf8] sm:$0xff]  ;;  %v805_v42 = vpack.c.bf16 %v230_v38, %v228_v37  ;;  %v232_v44 = vld [vmem:[#allocation7 + $0xe0] sm:$0xff] }
  0x49   :  { %792 = vmatprep.subr.bf16.mxu0 %v791_v59  ;;  %v419_v32 = vld [vmem:[#allocation9 + $0x28] sm:$0xff]  ;;  %v803_v35 = vpack.c.bf16 %v231_v28, %v229_v25  ;;  %v234_v45 = vld [vmem:[#allocation7 + $0xf0] sm:$0xff]  ;;  %v239_v47 = vld [vmem:[#allocation7 + $0x118] sm:$0xff] }
  0x4a   :  { %v233_v39 = vld [vmem:[#allocation7 + $0xe8] sm:$0xff]  ;;  %v837_v41 = vpack.c.bf16 %v419_v32, %v418_v31  ;;  %v809_v48 = vpack.c.bf16 %v234_v45, %v232_v44  ;;  %v236_v50 = vld [vmem:[#allocation7 + $0x100] sm:$0xff]  ;;  %v238_v51 = vld [vmem:[#allocation7 + $0x110] sm:$0xff] }
  0x4b   :  { %834 = vmatpush3.bf16.msra.mxu1 %v833_v29  ;;  %v807_v43 = vpack.c.bf16 %v235_v40, %v233_v39  ;;  %v237_v46 = vld [vmem:[#allocation7 + $0x108] sm:$0xff]  ;;  %v243_v53 = vld [vmem:[#allocation7 + $0x138] sm:$0xff]  ;;  %v813_v54 = vpack.c.bf16 %v238_v51, %v236_v50  ;;  %v240_v56 = vld [vmem:[#allocation7 + $0x120] sm:$0xff] }
  0x4c   :  { %794 = vmatpush1.bf16.msra.mxu0 %v793_v0  ;;  %836 = vmatprep.subr.bf16.mxu1 %v835_v30  ;;  %v811_v49 = vpack.c.bf16 %v239_v47, %v237_v46  ;;  %v241_v52 = vld [vmem:[#allocation7 + $0x128] sm:$0xff]  ;;  %v242_v57 = vld [vmem:[#allocation7 + $0x130] sm:$0xff]  ;;  %v247_v59 = vld [vmem:[#allocation7 + $0x158] sm:$0xff] }
  0x4d   :  { %796 = vmatprep.subr.bf16.mxu0 %v795_v3  ;;  %v815_v55 = vpack.c.bf16 %v243_v53, %v241_v52  ;;  %v245_v58 = vld [vmem:[#allocation7 + $0x148] sm:$0xff]  ;;  %v817_v60 = vpack.c.bf16 %v242_v57, %v240_v56  ;;  %v244_v62 = vld [vmem:[#allocation7 + $0x140] sm:$0xff]  ;;  %v246_v63 = vld [vmem:[#allocation7 + $0x150] sm:$0xff] }
  0x4e   :  { %v819_v61 = vpack.c.bf16 %v247_v59, %v245_v58  ;;  %v249_v0 = vld [vmem:[#allocation7 + $0x168] sm:$0xff]  ;;  %v251_v2 = vld [vmem:[#allocation7 + $0x178] sm:$0xff]  ;;  %v821_v3 = vpack.c.bf16 %v246_v63, %v244_v62  ;;  %v248_v5 = vld [vmem:[#allocation7 + $0x160] sm:$0xff] }
  0x4f   :  { %838 = vmatpush3.bf16.msra.mxu1 %v837_v41  ;;  %v823_v4 = vpack.c.bf16 %v251_v2, %v249_v0  ;;  %v250_v6 = vld [vmem:[#allocation7 + $0x170] sm:$0xff]  ;;  %v199_v12 = vld [vmem:[#allocation2 + $0x18] sm:$0xff]  ;;  %v201_v14 = vld [vmem:[#allocation2 + $0x28] sm:$0xff] }
  0x50   :  { %798 = vmatpush1.bf16.msra.mxu0 %v797_v15  ;;  %v825_v7 = vpack.c.bf16 %v250_v6, %v248_v5  ;;  %v203_v17 = vld [vmem:[#allocation2 + $0x38] sm:$0xff]  ;;  %v436_v19 = vld [vmem:[#allocation9 + $0xb0] sm:$0xff]  ;;  %v438_v25 = vld [vmem:[#allocation9 + $0xc0] sm:$0xff] }
  0x51   :  { %800 = vmatprep.subr.bf16.mxu0 %v799_v20  ;;  %v437_v20 = vld [vmem:[#allocation9 + $0xb8] sm:$0xff]  ;;  %v420_v22 = vld [vmem:[#allocation9 + $0x30] sm:$0xff]  ;;  %v439_v28 = vld [vmem:[#allocation9 + $0xc8] sm:$0xff] }
  0x52   :  { %v839_v21 = vpack.c.bf16 %v437_v20, %v436_v19  ;;  %v421_v23 = vld [vmem:[#allocation9 + $0x38] sm:$0xff]  ;;  %v843_v29 = vpack.c.bf16 %v439_v28, %v438_v25  ;;  %v422_v30 = vld [vmem:[#allocation9 + $0x40] sm:$0xff]  ;;  %v423_v31 = vld [vmem:[#allocation9 + $0x48] sm:$0xff] }
  0x53   :  { %v841_v24 = vpack.c.bf16 %v421_v23, %v420_v22  ;;  %v845_v32 = vpack.c.bf16 %v423_v31, %v422_v30  ;;  %v424_v38 = vld [vmem:[#allocation9 + $0x50] sm:$0xff]  ;;  %v425_v39 = vld [vmem:[#allocation9 + $0x58] sm:$0xff]  ;;  %v442_v41 = vld [vmem:[#allocation9 + $0xe0] sm:$0xff] }
  0x54   :  { %802 = vmatpush1.bf16.msra.mxu0 %v801_v34  ;;  %840 = vmatprep.subr.bf16.mxu1 %v839_v21  ;;  %v440_v34 = vld [vmem:[#allocation9 + $0xd0] sm:$0xff]  ;;  %v849_v40 = vpack.c.bf16 %v425_v39, %v424_v38  ;;  %v426_v44 = vld [vmem:[#allocation9 + $0x60] sm:$0xff]  ;;  %v427_v45 = vld [vmem:[#allocation9 + $0x68] sm:$0xff] }
  0x55   :  { %804 = vmatprep.subr.bf16.mxu0 %v803_v35  ;;  %842 = vmatpush3.bf16.msra.mxu1 %v841_v24  ;;  %v441_v35 = vld [vmem:[#allocation9 + $0xd8] sm:$0xff]  ;;  %v853_v46 = vpack.c.bf16 %v427_v45, %v426_v44  ;;  %v444_v47 = vld [vmem:[#allocation9 + $0xf0] sm:$0xff]  ;;  %v446_v53 = vld [vmem:[#allocation9 + $0x100] sm:$0xff] }
  0x56   :  { %844 = vmatprep.subr.bf16.mxu1 %v843_v29  ;;  %v847_v37 = vpack.c.bf16 %v441_v35, %v440_v34  ;;  %v428_v50 = vld [vmem:[#allocation9 + $0x70] sm:$0xff]  ;;  %v429_v51 = vld [vmem:[#allocation9 + $0x78] sm:$0xff]  ;;  %v675_v56 = vld [vmem:[%s1186_s3] ss:$0 sm:$0xff] }
  0x57   :  { %v857_v52 = vpack.c.bf16 %v429_v51, %v428_v50  ;;  %v448_v22 = vld [vmem:[#allocation9 + $0x110] sm:$0xff]  ;;  %v449_v23 = vld [vmem:[#allocation9 + $0x118] sm:$0xff]  ;;  %v451_v34 = vld [vmem:[#allocation9 + $0x128] sm:$0xff] }
  0x58   :  { %806 = vmatpush1.bf16.msra.mxu0 %v805_v42  ;;  %v443_v42 = vld [vmem:[#allocation9 + $0xe8] sm:$0xff]  ;;  %v863_v31 = vpack.c.bf16 %v449_v23, %v448_v22  ;;  %v453_v38 = vld [vmem:[#allocation9 + $0x138] sm:$0xff]  ;;  %v458_v45 = vld [vmem:[#allocation9 + $0x160] sm:$0xff] }
  0x59   :  { %808 = vmatprep.subr.bf16.mxu0 %v807_v43  ;;  %846 = vmatpush3.bf16.msra.mxu1 %v845_v32  ;;  %v851_v43 = vpack.c.bf16 %v443_v42, %v442_v41  ;;  %v450_v32 = vld [vmem:[#allocation9 + $0x120] sm:$0xff]  ;;  %v455_v41 = vld [vmem:[#allocation9 + $0x148] sm:$0xff]  ;;  %v456_v42 = vld [vmem:[#allocation9 + $0x150] sm:$0xff] }
  0x5a   :  { %848 = vmatprep.subr.bf16.mxu1 %v847_v37  ;;  %v867_v35 = vpack.c.bf16 %v451_v34, %v450_v32  ;;  %v452_v37 = vld [vmem:[#allocation9 + $0x130] sm:$0xff] }
  0x5b   :  { %v871_v1 = vpack.c.bf16 %v453_v38, %v452_v37 }
  0x5c   :  { %810 = vmatpush1.bf16.msra.mxu0 %v809_v48  ;;  %v445_v48 = vld [vmem:[#allocation9 + $0xf8] sm:$0xff] }
  0x5d   :  { %812 = vmatprep.subr.bf16.mxu0 %v811_v49  ;;  %850 = vmatpush3.bf16.msra.mxu1 %v849_v40  ;;  %v855_v49 = vpack.c.bf16 %v445_v48, %v444_v47  ;;  %v454_v40 = vld [vmem:[#allocation9 + $0x140] sm:$0xff]  ;;  %v460_v47 = vld [vmem:[#allocation9 + $0x170] sm:$0xff]  ;;  %v461_v48 = vld [vmem:[#allocation9 + $0x178] sm:$0xff] }
  0x5e   :  { %852 = vmatprep.subr.bf16.mxu1 %v851_v43  ;;  %v457_v43 = vld [vmem:[#allocation9 + $0x158] sm:$0xff] }
  0x5f   :  { %v879_v44 = vpack.c.bf16 %v457_v43, %v456_v42 }
  0x60   :  { %814 = vmatpush1.bf16.msra.mxu0 %v813_v54  ;;  %v447_v54 = vld [vmem:[#allocation9 + $0x108] sm:$0xff] }
  0x61   :  { %816 = vmatprep.subr.bf16.mxu0 %v815_v55  ;;  %854 = vmatpush3.bf16.msra.mxu1 %v853_v46  ;;  %v859_v55 = vpack.c.bf16 %v447_v54, %v446_v53  ;;  %v459_v46 = vld [vmem:[#allocation9 + $0x168] sm:$0xff] }
  0x62   :  { %856 = vmatprep.subr.bf16.mxu1 %v855_v49  ;;  %v887_v49 = vpack.c.bf16 %v461_v48, %v460_v47 }
  0x64   :  { %818 = vmatpush1.bf16.msra.mxu0 %v817_v60 }
  0x65   :  { %820 = vmatprep.subr.bf16.mxu0 %v819_v61  ;;  %858 = vmatpush3.bf16.msra.mxu1 %v857_v52 }
  0x66   :  { %860 = vmatprep.subr.bf16.mxu1 %v859_v55 }
  0x68   :  { %822 = vmatpush1.bf16.msra.mxu0 %v821_v3 }
  0x69   :  { %824 = vmatprep.subr.bf16.mxu0 %v823_v4 }
  0x6c   :  { %826 = vmatpush1.bf16.msra.mxu0 %v825_v7 }
  0xaa   :  { %v163_v8 = vpop.permute.xlu0 %162 }
  0xab   :  { %v167_v9 = vpop.permute.xlu1 %166  ;;  %175 = vst.msk [vmem:[#allocation2] sm:$0xff] %vm174_vm7, %v163_v8 }
  0xac   :  { %177 = vst.msk [vmem:[#allocation2 + $0x20] sm:$0xff] %vm174_vm7, %v167_v9 }
  0xae   :  { %v165_v10 = vpop.permute.xlu0 %164 }
  0xaf   :  { %v169_v11 = vpop.permute.xlu1 %168  ;;  %176 = vst.msk [vmem:[#allocation2 + $0x10] sm:$0xff] %vm174_vm7, %v165_v10 }
  0xb0   :  { %178 = vst.msk [vmem:[#allocation2 + $0x30] sm:$0xff] %vm174_vm7, %v169_v11 }
  0xb2   :  { %v196_v13 = vld [vmem:[#allocation2] sm:$0xff] }
  0xb3   :  { %329 = vmatmul.mubr.f32.vlgmr.msra.gmra.mrb[0].mxu0 %v196_v13  ;;  %v200_v16 = vld [vmem:[#allocation2 + $0x20] sm:$0xff] }
  0xb4   :  { %672 = vmatprep.mubr.msk.f32.mxu0 %vm153_vm0, %v199_v12 }
  0xb6   :  { %v198_v15 = vld [vmem:[#allocation2 + $0x10] sm:$0xff] }
  0xb7   :  { %335 = vmatmul.mubr.f32.gmra.mrb[2].mxu0 %v198_v15  ;;  %v202_v18 = vld [vmem:[#allocation2 + $0x30] sm:$0xff] }
  0xb8   :  { %673 = vmatprep.mubr.msk.f32.mxu0 %vm153_vm0, %v201_v14 }
  0xbb   :  { %341 = vmatmul.mubr.f32.gmra.mrb[4].mxu0 %v200_v16 }
  0xbc   :  { %674 = vmatprep.mubr.msk.f32.mxu0 %vm153_vm0, %v203_v17 }
  0xbf   :  { %347 = vmatmul.mubr.f32.gmra.mrb[6].mxu0 %v202_v18 }
 0x186   :  { %v330_v57 = vpop.f32.mrb[0].mxu0 }
 0x187   :  { %v358_v58 = vadd.f32 %v675_v56, %v330_v57  ;;  %v1133_v59 = vpop.f32.mrb[1].mxu0 }
 0x189   :  { %v362_v60 = vmax.f32 %v358_v58, 0.0 }
 0x18a   :  { %v336_v61 = vpop.f32.mrb[2].mxu0 }
 0x18b   :  { %v359_v62 = vadd.f32 %v675_v56, %v336_v61  ;;  %v1135_v63 = vpop.f32.mrb[3].mxu0  ;;  %526 = vmatprep.mubr.f32.mxu1 %v362_v60  ;;  %v366_v2 = vrot.slane %v362_v60, 7  ;;  %v386_v4 = vrot.slane %v362_v60, 1 }
 0x18d   :  { %v363_v0 = vmax.f32 %v359_v62, 0.0 }
 0x18e   :  { %v342_v3 = vpop.f32.mrb[4].mxu0 }
 0x18f   :  { %v367_v5 = vrot.slane %v363_v0, 7  ;;  %v387_v6 = vrot.slane %v363_v0, 1  ;;  %v360_v7 = vadd.f32 %v675_v56, %v342_v3  ;;  %v1137_v8 = vpop.f32.mrb[5].mxu0 }
 0x191   :  { %v364_v9 = vmax.f32 %v360_v7, 0.0  ;;  %v372_v10 = vsel %vm144_vm1, %v366_v2, %v367_v5  ;;  %v392_v11 = vsel %vm183_vm2, %v386_v4, %v387_v6 }
 0x192   :  { %v348_v12 = vpop.f32.mrb[6].mxu0 }
 0x193   :  { %v368_v13 = vrot.slane %v364_v9, 7  ;;  %v388_v14 = vrot.slane %v364_v9, 1  ;;  %v361_v15 = vadd.f32 %v675_v56, %v348_v12  ;;  %v1143_v16 = vpop.f32.mrb[7].mxu0 }
 0x195   :  { %v391_v17 = vsel %vm183_vm2, %v387_v6, %v388_v14  ;;  %v365_v18 = vmax.f32 %v361_v15, 0.0  ;;  %v371_v19 = vsel %vm144_vm1, %v367_v5, %v368_v13  ;;  %v676_v6 = vld [vmem:[%s1186_s3 + $0x1] ss:$0 sm:$0xff]  ;;  %s967_s3 = scalar_lea.vmem %s655_s6, 512 }
 0x196   :  { %v376_v39 = vmul.f32 %v1090_v26, %v371_v19  ;;  %v883_v26 = vpack.c.bf16 %v459_v46, %v458_v45  ;;  %v395_v50 = vmul.f32 %v1092_v27, %v391_v17  ;;  %p968_p10 = scmp.ne.s32.totalorder %s655_s6, %s967_s3  ;;  %p973_p12 = scmp.lt.s32.totalorder %s967_s3, %s967_s3 }
 0x197   :  { %v369_v20 = vrot.slane %v365_v18, 7  ;;  %v389_v21 = vrot.slane %v365_v18, 1 }
 0x198   :  { %p974_p13 = por %p973_p12, %p972_p11 }
 0x199   :  { %v373_v24 = vsel %vm144_vm1, %v369_v20, %v366_v2  ;;  %v370_v25 = vsel %vm144_vm1, %v368_v13, %v369_v20  ;;  %v390_v28 = vsel %vm183_vm2, %v388_v14, %v389_v21  ;;  %v393_v29 = vsel %vm183_vm2, %v389_v21, %v386_v4 }
 0x19a   :  { %v374_v30 = vmul.f32 %v1102_v33, %v373_v24  ;;  %v875_v33 = vpack.c.bf16 %v455_v41, %v454_v40  ;;  %v397_v51 = vmul.f32 %v1107_v36, %v393_v29  ;;  %p975_p0 = pnand %p974_p13, %p968_p10 }
 0x19c   :  { %527 = vmatmul.mubr.f32.vlgmr.msra.gmra.mrb[0].mxu1 %v374_v30 }
 0x19d   :  { %862 = vmatpush3.bf16.msra.mxu1 %v859_v55  ;;  %531 = vmatprep.mubr.f32.mxu1 %v363_v0 }
 0x19e   :  { %864 = vmatprep.subr.bf16.mxu1 %v863_v31 }
 0x1a0   :  { %532 = vmatmul.mubr.f32.gmra.mrb[2].mxu1 %v372_v10 }
 0x1a1   :  { %866 = vmatpush3.bf16.msra.mxu1 %v863_v31  ;;  %536 = vmatprep.mubr.f32.mxu1 %v364_v9 }
 0x1a2   :  { %868 = vmatprep.subr.bf16.mxu1 %v867_v35 }
 0x1a4   :  { %537 = vmatmul.mubr.f32.gmra.mrb[4].mxu1 %v376_v39 }
 0x1a5   :  { %870 = vmatpush3.bf16.msra.mxu1 %v867_v35  ;;  %541 = vmatprep.mubr.f32.mxu1 %v365_v18 }
 0x1a6   :  { %872 = vmatprep.subr.bf16.mxu1 %v871_v1 }
 0x1a8   :  { %542 = vmatmul.mubr.f32.gmra.mrb[6].mxu1 %v370_v25 }
 0x1a9   :  { %874 = vmatpush3.bf16.msra.mxu1 %v871_v1  ;;  %773 = vmatprep.mubr.f32.mxu1 %v392_v11 }
 0x1aa   :  { %876 = vmatprep.subr.bf16.mxu1 %v875_v33 }
 0x1ad   :  { %878 = vmatpush3.bf16.msra.mxu1 %v875_v33 }
 0x1ae   :  { %880 = vmatprep.subr.bf16.mxu1 %v879_v44 }
 0x1b1   :  { %882 = vmatpush3.bf16.msra.mxu1 %v879_v44 }
 0x1b2   :  { %884 = vmatprep.subr.bf16.mxu1 %v883_v26 }
 0x1b5   :  { %886 = vmatpush3.bf16.msra.mxu1 %v883_v26 }
 0x1b6   :  { %888 = vmatprep.subr.bf16.mxu1 %v887_v49 }
 0x1b9   :  { %890 = vmatpush3.bf16.msra.mxu1 %v887_v49 }
 0x1bc   :  { %774 = vmatmul.mubr.f32.vlgmr.msra.gmra.mrb[8].mxu1 %v395_v50 }
 0x1bd   :  { %776 = vmatprep.mubr.f32.mxu1 %v390_v28 }
 0x1c0   :  { %777 = vmatmul.mubr.f32.gmra.mrb[10].mxu1 %v397_v51 }
 0x26f   :  { %v709_v52 = vpop.f32.mrb[0].mxu1 }
 0x270   :  { %v710_v53 = vpop.f32.mrb[1].mxu1 }
 0x271   :  { %v711_v54 = vadd.f32 %v710_v53, %v709_v52 }
 0x273   :  { %v712_v55 = vpop.f32.mrb[2].mxu1  ;;  %v529_v56 = vadd.f32 %v711_v54, %v1133_v59 }
 0x274   :  { %v713_v57 = vpop.f32.mrb[3].mxu1 }
 0x275   :  { %v714_v58 = vadd.f32 %v713_v57, %v712_v55 }
 0x277   :  { %v715_v60 = vpop.f32.mrb[4].mxu1  ;;  %v534_v61 = vadd.f32 %v714_v58, %v1135_v63 }
 0x278   :  { %v716_v62 = vpop.f32.mrb[5].mxu1 }
 0x279   :  { %v717_v0 = vadd.f32 %v716_v62, %v715_v60 }
 0x27b   :  { %v718_v2 = vpop.f32.mrb[6].mxu1  ;;  %v539_v27 = vadd.f32 %v717_v0, %v1137_v8 }
 0x27c   :  { %v719_v3 = vpop.f32.mrb[7].mxu1 }
 0x27d   :  { %v720_v4 = vadd.f32 %v719_v3, %v718_v2 }
 0x27f   :  { %v544_v36 = vadd.f32 %v720_v4, %v1143_v16 }
 0x28f   :  { %v775_v5 = vpop.f32.mrb[8].mxu1 }
 0x290   :  { %v619_v59 = vadd.f32 %v775_v5, %v534_v61  ;;  %v613_v7 = vpop.f32.mrb[9].mxu1 }
 0x291   :  { %v614_v9 = vadd.f32 %v613_v7, %v529_v56 }
 0x292   :  { %v638_v10 = vadd.f32 %v676_v6, %v619_v59 }
 0x293   :  { %v637_v11 = vadd.f32 %v676_v6, %v614_v9  ;;  %v778_v63 = vpop.f32.mrb[10].mxu1 }
 0x294   :  { %v642_v12 = vmax.f32 %v638_v10, 0.0  ;;  %v629_v13 = vadd.f32 %v778_v63, %v544_v36  ;;  %v623_v14 = vpop.f32.mrb[11].mxu1 }
 0x295   :  { %v641_v15 = vmax.f32 %v637_v11, 0.0  ;;  %v624_v8 = vadd.f32 %v623_v14, %v539_v27 }
 0x296   :  { %646 = vst [vmem:[#allocation10 + $0x8] sm:$0xff] %v642_v12  ;;  %v640_v17 = vadd.f32 %v676_v6, %v629_v13 }
 0x297   :  { %645 = vst [vmem:[#allocation10] sm:$0xff] %v641_v15  ;;  %v639_v16 = vadd.f32 %v676_v6, %v624_v8 }
 0x298   :  { %v644_v18 = vmax.f32 %v640_v17, 0.0 }
 0x299   :  { %v643_v19 = vmax.f32 %v639_v16, 0.0 }
 0x29a   :  { %648 = vst [vmem:[#allocation10 + $0x18] sm:$0xff] %v644_v18 }
 0x29b   :  { %647 = vst [vmem:[#allocation10 + $0x10] sm:$0xff] %v643_v19 }
 0x29c   :  { %978 = shalt.err (!%p975_p0)
}
 0x29d   :  { %s979_s9 = scalar_lea.hbm %s1187_s4, 512 }
 0x29e   :  { %p980_p1 = scmp.ne.s32.totalorder %s1187_s4, %s979_s9  ;;  %p983_p2 = scmp.lt.u32.totalorder %s979_s9, %s1187_s4 }
 0x2a0   :  { %p985_p3 = pnand %p983_p2, %p980_p1 }
 0x2a2   :  { %988 = shalt.err (!%p985_p3)
}
 0x2a3   :  { %660 = dma.vmem_to_hbm [thread:$0]  %s655_s6, 512, %s1187_s4, [#allocation6], %s999_s1, %s999_s1, %s1000_s13  }
 0x2a4   :  { %993 = dma.done.wait [#allocation6], 512  }
 0x2a5   :  { %994 = vsyncadd [#allocation6], 4294966784 }
 0x2a6   :  { %664 = vsyncpa [#allocation5], 1 }
 0x2a7   :  { %665 = vsyncpa [#allocation8], 1 }
 0x2a8   :  { %666 = vsyncpa [#allocation6], 1 }

</bundles_post_ra>
